<compile_context>
chip_gen: v5e
topology: v5e:2x2
jax: 0.10.0
libtpu: 0.0.40
codegen_flags: <defaults>
</compile_context>

<pallas_src>
import functools

import jax
import jax.numpy as jnp
import numpy as np
from jax import lax
from jax.experimental import pallas as pl
from jax.experimental.pallas import tpu as pltpu

# ---- deterministic slayerLoihi-style neuron / pool configuration ----------
V_TH_MANT   = 80
THETA       = float(V_TH_MANT * (1 << 6))        # 5120 (theta = vThMant * 2^6)
I_DECAY     = 1024.0                             # current decay (out of 4096)
V_DECAY     = 128.0                              # voltage decay (out of 4096)
I_KEEP      = (4096.0 - I_DECAY) / 4096.0        # 0.75
V_KEEP      = (4096.0 - V_DECAY) / 4096.0        # 0.96875
W_SCALE     = float(1 << 6)                      # synaptic weight scale 2^6
TS          = 1.0                                # simulation time step
KERNEL_SIZE = 2
# slayerLoihi.pool: per-tap weight ~= quantize(1.1*vThMant, 2) = 88
POOL_WEIGHT = 88.0
SYN_GAIN    = POOL_WEIGHT * W_SCALE              # combined synaptic gain = 5632

LANE        = 128    # lane width (pixels per row)
R_TILE_MAX  = 256    # max pixel-row tile (multiple of 32 -> int8 tiling safe)
CHUNK_ROWS  = 32     # rows per register-carried chunk (4 f32 vregs / state plane)
TB_MAX      = 32     # time steps per grid step
# TODO(synk): only stride==kernelSize, padding=0, dilation=1 (the module
# defaults) are implemented; general stride/padding/dilation and the odd-size
# zero padding of _poolLayer are not expressed here.


def _round_up(x, m):
    return -(-x // m) * m


def _make_pool_loihi_kernel(tb_steps, chunk, n_chunks):
    """Builds the fused pool+CUBA+delay kernel for a given block geometry.

    x_ref: (TB, R_TILE, 128) int8 pre-pooled spike counts for TB time steps.
    o_ref: (TB, R_TILE, 128) int8 delayed spikes (0/1).
    u_ref/v_ref: (R_TILE, 128) f32 persistent current / voltage.
    s_ref:       (R_TILE, 128) int8 persistent previous spike (delay line).
    """

    def kernel(x_ref, o_ref, u_ref, v_ref, s_ref):
        tb = pl.program_id(1)             # time-block index (innermost, sequential)

        @pl.when(tb == 0)
        def _():
            u_ref[...] = jnp.zeros_like(u_ref)
            v_ref[...] = jnp.zeros_like(v_ref)
            s_ref[...] = jnp.zeros_like(s_ref)

        def chunk_body(c, carry):
            if n_chunks == 1:
                rs = slice(None)
            else:
                rs = pl.ds(pl.multiple_of(c * chunk, chunk), chunk)

            # Register-carried neuron state for this pixel-row chunk: loaded
            # from scratch once, written back once (no per-step VMEM traffic).
            u0 = u_ref[rs, :]
            v0 = v_ref[rs, :]
            s0 = s_ref[rs, :]

            def step(t, uvs):
                u, v, s = uvs
                # delayShift(spike, 1): emit the spike of the previous step.
                o_ref[t, rs, :] = s
                # weightOp (pre-pooled counts) * pool weight * weight scale.
                wsp = x_ref[t, rs, :].astype(jnp.float32) * SYN_GAIN
                # spikeLoihi CUBA dynamics. u, v are non-negative here
                # (inputs >= 0, POOL_WEIGHT > 0, reset-to-zero), so Loihi's
                # integer decay sign(x)*floor(|x|*keep) reduces to
                # floor(x*keep); exact in f32 while magnitudes stay
                # integer-valued well below 2^24 (max |v| here ~1e5).
                u = jnp.floor(u * I_KEEP) + wsp
                v = jnp.floor(v * V_KEEP) + u
                spk = v >= THETA
                v = jnp.where(spk, 0.0, v)
                s = spk.astype(jnp.int8)          # spike magnitude handled outside
                return (u, v, s)

            u, v, s = lax.fori_loop(0, tb_steps, step, (u0, v0, s0), unroll=True)

            u_ref[rs, :] = u
            v_ref[rs, :] = v
            s_ref[rs, :] = s
            return carry

        if n_chunks == 1:
            chunk_body(0, 0)
        else:
            lax.fori_loop(0, n_chunks, chunk_body, 0, unroll=False)

    return kernel


def pool_block_forward(spike, kernel_size=KERNEL_SIZE, count_log=False):
    """poolBlock forward. spike: (N, C, H, W, T) float32 of 0/1 spikes."""
    spike = spike.astype(jnp.float32)
    N, C, H, W, T = spike.shape
    k = kernel_size
    assert H % k == 0 and W % k == 0, "odd-size zero padding not implemented"
    assert k * k <= 127, "int8 pooled counts overflow for kernelSize >= 12"
    Ho, Wo = H // k, W // k
    P = N * C * Ho * Wo

    # ---- pre-pool (spatial sum of weightOp), cast to int8 BEFORE the
    #      time-major transpose/pad so those passes move 1 B/elem, not 4 ----
    # TODO(synk): if the upstream block can hand spikes already int8/pooled/
    # time-major (and downstream consume time-major), these wrapper passes
    # (the dominant HBM cost) would disappear entirely.
    pooled = spike.reshape(N, C, Ho, k, Wo, k, T).sum(axis=(3, 5))     # (N,C,Ho,Wo,T)
    pooled = pooled.astype(jnp.int8)                                   # counts <= k*k
    pooled = jnp.moveaxis(pooled, -1, 0).reshape(T, P)                 # (T, P) int8

    # ---- tiling: lanes = 128 pixels, sublane-dense pixel rows, blocked time ----
    R0 = -(-P // LANE)
    if R0 <= CHUNK_ROWS:
        R_TILE = R0                      # tiny problem: single full-dim block
    else:
        # Aim for >= 2 pixel-row blocks (keeps both v7x TensorCores busy),
        # rounded to the int8 sublane tile (32), capped at R_TILE_MAX.
        R_TILE = min(R_TILE_MAX, _round_up(-(-R0 // 2), CHUNK_ROWS))
    R = _round_up(R0, R_TILE)
    P_pad = R * LANE
    CHUNK = min(CHUNK_ROWS, R_TILE)

    TB = min(T, TB_MAX)
    T_pad = _round_up(T, TB)

    if (T_pad != T) or (P_pad != P):
        pooled = jnp.pad(pooled, ((0, T_pad - T), (0, P_pad - P)))
    x = pooled.reshape(T_pad, R, LANE)

    kernel = _make_pool_loihi_kernel(TB, CHUNK, R_TILE // CHUNK)

    out = pl.pallas_call(
        kernel,
        out_shape=jax.ShapeDtypeStruct((T_pad, R, LANE), jnp.int8),
        grid_spec=pltpu.PrefetchScalarGridSpec(
            num_scalar_prefetch=0,
            grid=(R // R_TILE, T_pad // TB),         # (pixel blocks, time blocks)
            in_specs=[pl.BlockSpec((TB, R_TILE, LANE), lambda r, t: (t, r, 0))],
            out_specs=pl.BlockSpec((TB, R_TILE, LANE), lambda r, t: (t, r, 0)),
            scratch_shapes=[
                pltpu.VMEM((R_TILE, LANE), jnp.float32),   # current u
                pltpu.VMEM((R_TILE, LANE), jnp.float32),   # voltage v
                pltpu.VMEM((R_TILE, LANE), jnp.int8),      # previous spike (delay)
            ],
        ),
        compiler_params=pltpu.CompilerParams(
            # pixel-row axis is independent -> "parallel" (megacore sharding);
            # time is a recurrence and must stay innermost + "arbitrary" so the
            # tb==0 state reset is correct per pixel block.
            dimension_semantics=("parallel", "arbitrary")),
    )(x)

    # ---- un-pad, back to (N,C,Ho,Wo,T); widen-to-f32 fused after transpose ----
    out = out.reshape(T_pad, P_pad)[:T, :P]
    out = out.reshape(T, N, C, Ho, Wo).transpose(1, 2, 3, 4, 0).astype(jnp.float32)
    if TS != 1.0:
        out = out * (1.0 / TS)           # spike magnitude is 1/TS
    if count_log:
        return out, None
    return out


def _reference(spike, kernel_size=KERNEL_SIZE):
    """Pure-JAX reference of the same forward pass (SLAYER semantics)."""
    spike = spike.astype(jnp.float32)
    N, C, H, W, T = spike.shape
    k = kernel_size
    Ho, Wo = H // k, W // k
    pooled = spike.reshape(N, C, Ho, k, Wo, k, T).sum(axis=(3, 5)) * POOL_WEIGHT
    u = jnp.zeros((N, C, Ho, Wo), jnp.float32)
    v = jnp.zeros((N, C, Ho, Wo), jnp.float32)
    spikes = []
    for t in range(T):
        wsp = pooled[..., t] * W_SCALE
        u = jnp.sign(u) * jnp.floor(jnp.abs(u) * ((4096.0 - I_DECAY) / 4096.0)) + wsp
        v = jnp.sign(v) * jnp.floor(jnp.abs(v) * ((4096.0 - V_DECAY) / 4096.0)) + u
        s = v >= THETA
        v = jnp.where(s, 0.0, v)
        spikes.append(jnp.where(s, 1.0 / TS, 0.0))
    s = jnp.stack(spikes, axis=-1)                                     # (N,C,Ho,Wo,T)
    # delayShift by 1 time step
    return jnp.concatenate([jnp.zeros_like(s[..., :1]), s[..., :-1]], axis=-1)


if __name__ == "__main__":
    key = jax.random.PRNGKey(0)
    N, C, H, W, T = 2, 4, 16, 16, 8
    spike = jax.random.bernoulli(key, p=0.1, shape=(N, C, H, W, T)).astype(jnp.float32)

    out = pool_block_forward(spike)
    out = jax.block_until_ready(out)

    ref = jax.block_until_ready(_reference(spike))
    np.testing.assert_allclose(np.asarray(out), np.asarray(ref), atol=1e-5)
    assert out.shape == (N, C, H // KERNEL_SIZE, W // KERNEL_SIZE, T)

    # second shape: large enough to exercise multi-block / multi-chunk path
    key2 = jax.random.PRNGKey(1)
    N2, C2, H2, W2, T2 = 2, 8, 32, 32, 20
    spike2 = jax.random.bernoulli(key2, p=0.1, shape=(N2, C2, H2, W2, T2)).astype(jnp.float32)
    out2 = jax.block_until_ready(pool_block_forward(spike2))
    ref2 = jax.block_until_ready(_reference(spike2))
    np.testing.assert_allclose(np.asarray(out2), np.asarray(ref2), atol=1e-5)

    print("KERNEL_OK")
</pallas_src>

<mosaic_0001>
module attributes {stable_mosaic.version = 11 : i64} {
  func.func @kernel(%arg0: i32, %arg1: i32, %arg2: memref<8x4x128xi8, #tpu.memory_space<vmem>>, %arg3: memref<8x4x128xi8, #tpu.memory_space<vmem>>, %arg4: memref<4x128xf32, #tpu.memory_space<vmem>>, %arg5: memref<4x128xf32, #tpu.memory_space<vmem>>, %arg6: memref<4x128xi8, #tpu.memory_space<vmem>>) attributes {dimension_semantics = [#tpu.dimension_semantics<parallel>, #tpu.dimension_semantics<arbitrary>], iteration_bounds = array<i64: 1, 1>, scalar_prefetch = 0 : i64, scratch_operands = 3 : i64, tpu.core_type = #tpu.core_type<tc>, window_params = [{transform_indices = @transform_0, window_bounds = array<i64: 8, 4, 128>}, {transform_indices = @transform_1, window_bounds = array<i64: 8, 4, 128>}]} {
    %c0_i32 = arith.constant 0 : i32
    %0 = arith.cmpi eq, %arg1, %c0_i32 : i32
    %1 = arith.extui %0 : i1 to i32
    %c0_i32_0 = arith.constant 0 : i32
    %2 = arith.cmpi ne, %1, %c0_i32_0 : i32
    scf.if %2 {
      %cst_84 = arith.constant 0.000000e+00 : f32
      %193 = vector.broadcast %cst_84 : f32 to vector<4x128xf32>
      %c0_85 = arith.constant 0 : index
      %c0_86 = arith.constant 0 : index
      %194 = vector.load %arg4[%c0_85, %c0_86] : memref<4x128xf32, #tpu.memory_space<vmem>>, vector<4x128xf32>
      tpu.vector_store %arg4[%c0_85, %c0_86], %193 {strides = array<i32>} : memref<4x128xf32, #tpu.memory_space<vmem>>, vector<4x128xf32>,
      %cst_87 = arith.constant 0.000000e+00 : f32
      %195 = vector.broadcast %cst_87 : f32 to vector<4x128xf32>
      %c0_88 = arith.constant 0 : index
      %c0_89 = arith.constant 0 : index
      %196 = vector.load %arg5[%c0_88, %c0_89] : memref<4x128xf32, #tpu.memory_space<vmem>>, vector<4x128xf32>
      tpu.vector_store %arg5[%c0_88, %c0_89], %195 {strides = array<i32>} : memref<4x128xf32, #tpu.memory_space<vmem>>, vector<4x128xf32>,
      %c0_i8 = arith.constant 0 : i8
      %197 = vector.broadcast %c0_i8 : i8 to vector<4x128xi8>
      %c0_90 = arith.constant 0 : index
      %c0_91 = arith.constant 0 : index
      %198 = vector.load %arg6[%c0_90, %c0_91] : memref<4x128xi8, #tpu.memory_space<vmem>>, vector<4x128xi8>
      tpu.vector_store %arg6[%c0_90, %c0_91], %197 {strides = array<i32>} : memref<4x128xi8, #tpu.memory_space<vmem>>, vector<4x128xi8>,
    } else {
    }
    %c0 = arith.constant 0 : index
    %c0_1 = arith.constant 0 : index
    %3 = vector.load %arg4[%c0, %c0_1] : memref<4x128xf32, #tpu.memory_space<vmem>>, vector<4x128xf32>
    %c0_2 = arith.constant 0 : index
    %c0_3 = arith.constant 0 : index
    %4 = vector.load %arg5[%c0_2, %c0_3] : memref<4x128xf32, #tpu.memory_space<vmem>>, vector<4x128xf32>
    %c0_4 = arith.constant 0 : index
    %c0_5 = arith.constant 0 : index
    %5 = vector.load %arg6[%c0_4, %c0_5] : memref<4x128xi8, #tpu.memory_space<vmem>>, vector<4x128xi8>
    %c0_i32_6 = arith.constant 0 : i32
    %6 = arith.index_cast %c0_i32_6 : i32 to index
    %c0_7 = arith.constant 0 : index
    %c0_8 = arith.constant 0 : index
    %7 = vector.load %arg3[%6, %c0_7, %c0_8] : memref<8x4x128xi8, #tpu.memory_space<vmem>>, vector<1x4x128xi8>
    %8 = vector.shape_cast %7 : vector<1x4x128xi8> to vector<4x128xi8>
    %9 = vector.shape_cast %5 : vector<4x128xi8> to vector<1x4x128xi8>
    tpu.vector_store %arg3[%6, %c0_7, %c0_8], %9 {strides = array<i32>} : memref<8x4x128xi8, #tpu.memory_space<vmem>>, vector<1x4x128xi8>,
    %10 = arith.index_cast %c0_i32_6 : i32 to index
    %c0_9 = arith.constant 0 : index
    %c0_10 = arith.constant 0 : index
    %11 = vector.load %arg2[%10, %c0_9, %c0_10] : memref<8x4x128xi8, #tpu.memory_space<vmem>>, vector<1x4x128xi8>
    %12 = vector.shape_cast %11 : vector<1x4x128xi8> to vector<4x128xi8>
    %13 = arith.sitofp %12 : vector<4x128xi8> to vector<4x128xf32>
    %cst = arith.constant 5.632000e+03 : f32
    %14 = vector.broadcast %cst : f32 to vector<4x128xf32>
    %15 = arith.mulf %13, %14 : vector<4x128xf32>
    %cst_11 = arith.constant 7.500000e-01 : f32
    %16 = vector.broadcast %cst_11 : f32 to vector<4x128xf32>
    %17 = arith.mulf %3, %16 : vector<4x128xf32>
    %18 = math.floor %17 : vector<4x128xf32>
    %19 = arith.addf %18, %15 : vector<4x128xf32>
    %cst_12 = arith.constant 9.687500e-01 : f32
    %20 = vector.broadcast %cst_12 : f32 to vector<4x128xf32>
    %21 = arith.mulf %4, %20 : vector<4x128xf32>
    %22 = math.floor %21 : vector<4x128xf32>
    %23 = arith.addf %22, %19 : vector<4x128xf32>
    %cst_13 = arith.constant 5.120000e+03 : f32
    %24 = vector.broadcast %cst_13 : f32 to vector<4x128xf32>
    %25 = arith.cmpf oge, %23, %24 : vector<4x128xf32>
    %cst_14 = arith.constant 0.000000e+00 : f32
    %26 = vector.broadcast %cst_14 : f32 to vector<4x128xf32>
    %27 = arith.select %25, %26, %23 : vector<4x128xi1>, vector<4x128xf32>
    %28 = arith.extui %25 : vector<4x128xi1> to vector<4x128xi8>
    %c1_i32 = arith.constant 1 : i32
    %29 = arith.index_cast %c1_i32 : i32 to index
    %c0_15 = arith.constant 0 : index
    %c0_16 = arith.constant 0 : index
    %30 = vector.load %arg3[%29, %c0_15, %c0_16] : memref<8x4x128xi8, #tpu.memory_space<vmem>>, vector<1x4x128xi8>
    %31 = vector.shape_cast %30 : vector<1x4x128xi8> to vector<4x128xi8>
    %32 = vector.shape_cast %28 : vector<4x128xi8> to vector<1x4x128xi8>
    tpu.vector_store %arg3[%29, %c0_15, %c0_16], %32 {strides = array<i32>} : memref<8x4x128xi8, #tpu.memory_space<vmem>>, vector<1x4x128xi8>,
    %33 = arith.index_cast %c1_i32 : i32 to index
    %c0_17 = arith.constant 0 : index
    %c0_18 = arith.constant 0 : index
    %34 = vector.load %arg2[%33, %c0_17, %c0_18] : memref<8x4x128xi8, #tpu.memory_space<vmem>>, vector<1x4x128xi8>
    %35 = vector.shape_cast %34 : vector<1x4x128xi8> to vector<4x128xi8>
    %36 = arith.sitofp %35 : vector<4x128xi8> to vector<4x128xf32>
    %cst_19 = arith.constant 5.632000e+03 : f32
    %37 = vector.broadcast %cst_19 : f32 to vector<4x128xf32>
    %38 = arith.mulf %36, %37 : vector<4x128xf32>
    %cst_20 = arith.constant 7.500000e-01 : f32
    %39 = vector.broadcast %cst_20 : f32 to vector<4x128xf32>
    %40 = arith.mulf %19, %39 : vector<4x128xf32>
    %41 = math.floor %40 : vector<4x128xf32>
    %42 = arith.addf %41, %38 : vector<4x128xf32>
    %cst_21 = arith.constant 9.687500e-01 : f32
    %43 = vector.broadcast %cst_21 : f32 to vector<4x128xf32>
    %44 = arith.mulf %27, %43 : vector<4x128xf32>
    %45 = math.floor %44 : vector<4x128xf32>
    %46 = arith.addf %45, %42 : vector<4x128xf32>
    %cst_22 = arith.constant 5.120000e+03 : f32
    %47 = vector.broadcast %cst_22 : f32 to vector<4x128xf32>
    %48 = arith.cmpf oge, %46, %47 : vector<4x128xf32>
    %cst_23 = arith.constant 0.000000e+00 : f32
    %49 = vector.broadcast %cst_23 : f32 to vector<4x128xf32>
    %50 = arith.select %48, %49, %46 : vector<4x128xi1>, vector<4x128xf32>
    %51 = arith.extui %48 : vector<4x128xi1> to vector<4x128xi8>
    %c2_i32 = arith.constant 2 : i32
    %52 = arith.index_cast %c2_i32 : i32 to index
    %c0_24 = arith.constant 0 : index
    %c0_25 = arith.constant 0 : index
    %53 = vector.load %arg3[%52, %c0_24, %c0_25] : memref<8x4x128xi8, #tpu.memory_space<vmem>>, vector<1x4x128xi8>
    %54 = vector.shape_cast %53 : vector<1x4x128xi8> to vector<4x128xi8>
    %55 = vector.shape_cast %51 : vector<4x128xi8> to vector<1x4x128xi8>
    tpu.vector_store %arg3[%52, %c0_24, %c0_25], %55 {strides = array<i32>} : memref<8x4x128xi8, #tpu.memory_space<vmem>>, vector<1x4x128xi8>,
    %56 = arith.index_cast %c2_i32 : i32 to index
    %c0_26 = arith.constant 0 : index
    %c0_27 = arith.constant 0 : index
    %57 = vector.load %arg2[%56, %c0_26, %c0_27] : memref<8x4x128xi8, #tpu.memory_space<vmem>>, vector<1x4x128xi8>
    %58 = vector.shape_cast %57 : vector<1x4x128xi8> to vector<4x128xi8>
    %59 = arith.sitofp %58 : vector<4x128xi8> to vector<4x128xf32>
    %cst_28 = arith.constant 5.632000e+03 : f32
    %60 = vector.broadcast %cst_28 : f32 to vector<4x128xf32>
    %61 = arith.mulf %59, %60 : vector<4x128xf32>
    %cst_29 = arith.constant 7.500000e-01 : f32
    %62 = vector.broadcast %cst_29 : f32 to vector<4x128xf32>
    %63 = arith.mulf %42, %62 : vector<4x128xf32>
    %64 = math.floor %63 : vector<4x128xf32>
    %65 = arith.addf %64, %61 : vector<4x128xf32>
    %cst_30 = arith.constant 9.687500e-01 : f32
    %66 = vector.broadcast %cst_30 : f32 to vector<4x128xf32>
    %67 = arith.mulf %50, %66 : vector<4x128xf32>
    %68 = math.floor %67 : vector<4x128xf32>
    %69 = arith.addf %68, %65 : vector<4x128xf32>
    %cst_31 = arith.constant 5.120000e+03 : f32
    %70 = vector.broadcast %cst_31 : f32 to vector<4x128xf32>
    %71 = arith.cmpf oge, %69, %70 : vector<4x128xf32>
    %cst_32 = arith.constant 0.000000e+00 : f32
    %72 = vector.broadcast %cst_32 : f32 to vector<4x128xf32>
    %73 = arith.select %71, %72, %69 : vector<4x128xi1>, vector<4x128xf32>
    %74 = arith.extui %71 : vector<4x128xi1> to vector<4x128xi8>
    %c3_i32 = arith.constant 3 : i32
    %75 = arith.index_cast %c3_i32 : i32 to index
    %c0_33 = arith.constant 0 : index
    %c0_34 = arith.constant 0 : index
    %76 = vector.load %arg3[%75, %c0_33, %c0_34] : memref<8x4x128xi8, #tpu.memory_space<vmem>>, vector<1x4x128xi8>
    %77 = vector.shape_cast %76 : vector<1x4x128xi8> to vector<4x128xi8>
    %78 = vector.shape_cast %74 : vector<4x128xi8> to vector<1x4x128xi8>
    tpu.vector_store %arg3[%75, %c0_33, %c0_34], %78 {strides = array<i32>} : memref<8x4x128xi8, #tpu.memory_space<vmem>>, vector<1x4x128xi8>,
    %79 = arith.index_cast %c3_i32 : i32 to index
    %c0_35 = arith.constant 0 : index
    %c0_36 = arith.constant 0 : index
    %80 = vector.load %arg2[%79, %c0_35, %c0_36] : memref<8x4x128xi8, #tpu.memory_space<vmem>>, vector<1x4x128xi8>
    %81 = vector.shape_cast %80 : vector<1x4x128xi8> to vector<4x128xi8>
    %82 = arith.sitofp %81 : vector<4x128xi8> to vector<4x128xf32>
    %cst_37 = arith.constant 5.632000e+03 : f32
    %83 = vector.broadcast %cst_37 : f32 to vector<4x128xf32>
    %84 = arith.mulf %82, %83 : vector<4x128xf32>
    %cst_38 = arith.constant 7.500000e-01 : f32
    %85 = vector.broadcast %cst_38 : f32 to vector<4x128xf32>
    %86 = arith.mulf %65, %85 : vector<4x128xf32>
    %87 = math.floor %86 : vector<4x128xf32>
    %88 = arith.addf %87, %84 : vector<4x128xf32>
    %cst_39 = arith.constant 9.687500e-01 : f32
    %89 = vector.broadcast %cst_39 : f32 to vector<4x128xf32>
    %90 = arith.mulf %73, %89 : vector<4x128xf32>
    %91 = math.floor %90 : vector<4x128xf32>
    %92 = arith.addf %91, %88 : vector<4x128xf32>
    %cst_40 = arith.constant 5.120000e+03 : f32
    %93 = vector.broadcast %cst_40 : f32 to vector<4x128xf32>
    %94 = arith.cmpf oge, %92, %93 : vector<4x128xf32>
    %cst_41 = arith.constant 0.000000e+00 : f32
    %95 = vector.broadcast %cst_41 : f32 to vector<4x128xf32>
    %96 = arith.select %94, %95, %92 : vector<4x128xi1>, vector<4x128xf32>
    %97 = arith.extui %94 : vector<4x128xi1> to vector<4x128xi8>
    %c4_i32 = arith.constant 4 : i32
    %98 = arith.index_cast %c4_i32 : i32 to index
    %c0_42 = arith.constant 0 : index
    %c0_43 = arith.constant 0 : index
    %99 = vector.load %arg3[%98, %c0_42, %c0_43] : memref<8x4x128xi8, #tpu.memory_space<vmem>>, vector<1x4x128xi8>
    %100 = vector.shape_cast %99 : vector<1x4x128xi8> to vector<4x128xi8>
    %101 = vector.shape_cast %97 : vector<4x128xi8> to vector<1x4x128xi8>
    tpu.vector_store %arg3[%98, %c0_42, %c0_43], %101 {strides = array<i32>} : memref<8x4x128xi8, #tpu.memory_space<vmem>>, vector<1x4x128xi8>,
    %102 = arith.index_cast %c4_i32 : i32 to index
    %c0_44 = arith.constant 0 : index
    %c0_45 = arith.constant 0 : index
    %103 = vector.load %arg2[%102, %c0_44, %c0_45] : memref<8x4x128xi8, #tpu.memory_space<vmem>>, vector<1x4x128xi8>
    %104 = vector.shape_cast %103 : vector<1x4x128xi8> to vector<4x128xi8>
    %105 = arith.sitofp %104 : vector<4x128xi8> to vector<4x128xf32>
    %cst_46 = arith.constant 5.632000e+03 : f32
    %106 = vector.broadcast %cst_46 : f32 to vector<4x128xf32>
    %107 = arith.mulf %105, %106 : vector<4x128xf32>
    %cst_47 = arith.constant 7.500000e-01 : f32
    %108 = vector.broadcast %cst_47 : f32 to vector<4x128xf32>
    %109 = arith.mulf %88, %108 : vector<4x128xf32>
    %110 = math.floor %109 : vector<4x128xf32>
    %111 = arith.addf %110, %107 : vector<4x128xf32>
    %cst_48 = arith.constant 9.687500e-01 : f32
    %112 = vector.broadcast %cst_48 : f32 to vector<4x128xf32>
    %113 = arith.mulf %96, %112 : vector<4x128xf32>
    %114 = math.floor %113 : vector<4x128xf32>
    %115 = arith.addf %114, %111 : vector<4x128xf32>
    %cst_49 = arith.constant 5.120000e+03 : f32
    %116 = vector.broadcast %cst_49 : f32 to vector<4x128xf32>
    %117 = arith.cmpf oge, %115, %116 : vector<4x128xf32>
    %cst_50 = arith.constant 0.000000e+00 : f32
    %118 = vector.broadcast %cst_50 : f32 to vector<4x128xf32>
    %119 = arith.select %117, %118, %115 : vector<4x128xi1>, vector<4x128xf32>
    %120 = arith.extui %117 : vector<4x128xi1> to vector<4x128xi8>
    %c5_i32 = arith.constant 5 : i32
    %121 = arith.index_cast %c5_i32 : i32 to index
    %c0_51 = arith.constant 0 : index
    %c0_52 = arith.constant 0 : index
    %122 = vector.load %arg3[%121, %c0_51, %c0_52] : memref<8x4x128xi8, #tpu.memory_space<vmem>>, vector<1x4x128xi8>
    %123 = vector.shape_cast %122 : vector<1x4x128xi8> to vector<4x128xi8>
    %124 = vector.shape_cast %120 : vector<4x128xi8> to vector<1x4x128xi8>
    tpu.vector_store %arg3[%121, %c0_51, %c0_52], %124 {strides = array<i32>} : memref<8x4x128xi8, #tpu.memory_space<vmem>>, vector<1x4x128xi8>,
    %125 = arith.index_cast %c5_i32 : i32 to index
    %c0_53 = arith.constant 0 : index
    %c0_54 = arith.constant 0 : index
    %126 = vector.load %arg2[%125, %c0_53, %c0_54] : memref<8x4x128xi8, #tpu.memory_space<vmem>>, vector<1x4x128xi8>
    %127 = vector.shape_cast %126 : vector<1x4x128xi8> to vector<4x128xi8>
    %128 = arith.sitofp %127 : vector<4x128xi8> to vector<4x128xf32>
    %cst_55 = arith.constant 5.632000e+03 : f32
    %129 = vector.broadcast %cst_55 : f32 to vector<4x128xf32>
    %130 = arith.mulf %128, %129 : vector<4x128xf32>
    %cst_56 = arith.constant 7.500000e-01 : f32
    %131 = vector.broadcast %cst_56 : f32 to vector<4x128xf32>
    %132 = arith.mulf %111, %131 : vector<4x128xf32>
    %133 = math.floor %132 : vector<4x128xf32>
    %134 = arith.addf %133, %130 : vector<4x128xf32>
    %cst_57 = arith.constant 9.687500e-01 : f32
    %135 = vector.broadcast %cst_57 : f32 to vector<4x128xf32>
    %136 = arith.mulf %119, %135 : vector<4x128xf32>
    %137 = math.floor %136 : vector<4x128xf32>
    %138 = arith.addf %137, %134 : vector<4x128xf32>
    %cst_58 = arith.constant 5.120000e+03 : f32
    %139 = vector.broadcast %cst_58 : f32 to vector<4x128xf32>
    %140 = arith.cmpf oge, %138, %139 : vector<4x128xf32>
    %cst_59 = arith.constant 0.000000e+00 : f32
    %141 = vector.broadcast %cst_59 : f32 to vector<4x128xf32>
    %142 = arith.select %140, %141, %138 : vector<4x128xi1>, vector<4x128xf32>
    %143 = arith.extui %140 : vector<4x128xi1> to vector<4x128xi8>
    %c6_i32 = arith.constant 6 : i32
    %144 = arith.index_cast %c6_i32 : i32 to index
    %c0_60 = arith.constant 0 : index
    %c0_61 = arith.constant 0 : index
    %145 = vector.load %arg3[%144, %c0_60, %c0_61] : memref<8x4x128xi8, #tpu.memory_space<vmem>>, vector<1x4x128xi8>
    %146 = vector.shape_cast %145 : vector<1x4x128xi8> to vector<4x128xi8>
    %147 = vector.shape_cast %143 : vector<4x128xi8> to vector<1x4x128xi8>
    tpu.vector_store %arg3[%144, %c0_60, %c0_61], %147 {strides = array<i32>} : memref<8x4x128xi8, #tpu.memory_space<vmem>>, vector<1x4x128xi8>,
    %148 = arith.index_cast %c6_i32 : i32 to index
    %c0_62 = arith.constant 0 : index
    %c0_63 = arith.constant 0 : index
    %149 = vector.load %arg2[%148, %c0_62, %c0_63] : memref<8x4x128xi8, #tpu.memory_space<vmem>>, vector<1x4x128xi8>
    %150 = vector.shape_cast %149 : vector<1x4x128xi8> to vector<4x128xi8>
    %151 = arith.sitofp %150 : vector<4x128xi8> to vector<4x128xf32>
    %cst_64 = arith.constant 5.632000e+03 : f32
    %152 = vector.broadcast %cst_64 : f32 to vector<4x128xf32>
    %153 = arith.mulf %151, %152 : vector<4x128xf32>
    %cst_65 = arith.constant 7.500000e-01 : f32
    %154 = vector.broadcast %cst_65 : f32 to vector<4x128xf32>
    %155 = arith.mulf %134, %154 : vector<4x128xf32>
    %156 = math.floor %155 : vector<4x128xf32>
    %157 = arith.addf %156, %153 : vector<4x128xf32>
    %cst_66 = arith.constant 9.687500e-01 : f32
    %158 = vector.broadcast %cst_66 : f32 to vector<4x128xf32>
    %159 = arith.mulf %142, %158 : vector<4x128xf32>
    %160 = math.floor %159 : vector<4x128xf32>
    %161 = arith.addf %160, %157 : vector<4x128xf32>
    %cst_67 = arith.constant 5.120000e+03 : f32
    %162 = vector.broadcast %cst_67 : f32 to vector<4x128xf32>
    %163 = arith.cmpf oge, %161, %162 : vector<4x128xf32>
    %cst_68 = arith.constant 0.000000e+00 : f32
    %164 = vector.broadcast %cst_68 : f32 to vector<4x128xf32>
    %165 = arith.select %163, %164, %161 : vector<4x128xi1>, vector<4x128xf32>
    %166 = arith.extui %163 : vector<4x128xi1> to vector<4x128xi8>
    %c7_i32 = arith.constant 7 : i32
    %167 = arith.index_cast %c7_i32 : i32 to index
    %c0_69 = arith.constant 0 : index
    %c0_70 = arith.constant 0 : index
    %168 = vector.load %arg3[%167, %c0_69, %c0_70] : memref<8x4x128xi8, #tpu.memory_space<vmem>>, vector<1x4x128xi8>
    %169 = vector.shape_cast %168 : vector<1x4x128xi8> to vector<4x128xi8>
    %170 = vector.shape_cast %166 : vector<4x128xi8> to vector<1x4x128xi8>
    tpu.vector_store %arg3[%167, %c0_69, %c0_70], %170 {strides = array<i32>} : memref<8x4x128xi8, #tpu.memory_space<vmem>>, vector<1x4x128xi8>,
    %171 = arith.index_cast %c7_i32 : i32 to index
    %c0_71 = arith.constant 0 : index
    %c0_72 = arith.constant 0 : index
    %172 = vector.load %arg2[%171, %c0_71, %c0_72] : memref<8x4x128xi8, #tpu.memory_space<vmem>>, vector<1x4x128xi8>
    %173 = vector.shape_cast %172 : vector<1x4x128xi8> to vector<4x128xi8>
    %174 = arith.sitofp %173 : vector<4x128xi8> to vector<4x128xf32>
    %cst_73 = arith.constant 5.632000e+03 : f32
    %175 = vector.broadcast %cst_73 : f32 to vector<4x128xf32>
    %176 = arith.mulf %174, %175 : vector<4x128xf32>
    %cst_74 = arith.constant 7.500000e-01 : f32
    %177 = vector.broadcast %cst_74 : f32 to vector<4x128xf32>
    %178 = arith.mulf %157, %177 : vector<4x128xf32>
    %179 = math.floor %178 : vector<4x128xf32>
    %180 = arith.addf %179, %176 : vector<4x128xf32>
    %cst_75 = arith.constant 9.687500e-01 : f32
    %181 = vector.broadcast %cst_75 : f32 to vector<4x128xf32>
    %182 = arith.mulf %165, %181 : vector<4x128xf32>
    %183 = math.floor %182 : vector<4x128xf32>
    %184 = arith.addf %183, %180 : vector<4x128xf32>
    %cst_76 = arith.constant 5.120000e+03 : f32
    %185 = vector.broadcast %cst_76 : f32 to vector<4x128xf32>
    %186 = arith.cmpf oge, %184, %185 : vector<4x128xf32>
    %cst_77 = arith.constant 0.000000e+00 : f32
    %187 = vector.broadcast %cst_77 : f32 to vector<4x128xf32>
    %188 = arith.select %186, %187, %184 : vector<4x128xi1>, vector<4x128xf32>
    %189 = arith.extui %186 : vector<4x128xi1> to vector<4x128xi8>
    %c8_i32 = arith.constant 8 : i32
    %c0_78 = arith.constant 0 : index
    %c0_79 = arith.constant 0 : index
    %190 = vector.load %arg4[%c0_78, %c0_79] : memref<4x128xf32, #tpu.memory_space<vmem>>, vector<4x128xf32>
    tpu.vector_store %arg4[%c0_78, %c0_79], %180 {strides = array<i32>} : memref<4x128xf32, #tpu.memory_space<vmem>>, vector<4x128xf32>,
    %c0_80 = arith.constant 0 : index
    %c0_81 = arith.constant 0 : index
    %191 = vector.load %arg5[%c0_80, %c0_81] : memref<4x128xf32, #tpu.memory_space<vmem>>, vector<4x128xf32>
    tpu.vector_store %arg5[%c0_80, %c0_81], %188 {strides = array<i32>} : memref<4x128xf32, #tpu.memory_space<vmem>>, vector<4x128xf32>,
    %c0_82 = arith.constant 0 : index
    %c0_83 = arith.constant 0 : index
    %192 = vector.load %arg6[%c0_82, %c0_83] : memref<4x128xi8, #tpu.memory_space<vmem>>, vector<4x128xi8>
    tpu.vector_store %arg6[%c0_82, %c0_83], %189 {strides = array<i32>} : memref<4x128xi8, #tpu.memory_space<vmem>>, vector<4x128xi8>,
    return
  }
  func.func @transform_0(%arg0: i32, %arg1: i32) -> (i32, i32, i32) {
    %c0_i32 = arith.constant 0 : i32
    %c0_i32_0 = arith.constant 0 : i32
    return %arg1, %arg0, %c0_i32 : i32, i32, i32
  }
  func.func @transform_1(%arg0: i32, %arg1: i32) -> (i32, i32, i32) {
    %c0_i32 = arith.constant 0 : i32
    %c0_i32_0 = arith.constant 0 : i32
    return %arg1, %arg0, %c0_i32 : i32, i32, i32
  }
}

</mosaic_0001>

<bundles_post_ra>
// kernel: tpu_custom_call.1
= control target key start
LH: loop header
LB: loop body
LE: loop exit
PB: predicated region body
PF: predicated region fallthrough
CT: control target
= control target key end

     0   :  { %6 = vsyncpa [#allocation6], 0  ;;  %s328_s0 = inlined_call_operand.hbm [shape: s8[8,4,128], index: 0, kind: input, shape index: {}]   ;;  %s329_s1 = inlined_call_operand.hbm [shape: s8[8,4,128], index: 1, kind: output, shape index: {}]  }
   0x1   :  { %7 = vsyncpa [#allocation7], 0  ;;  %s12_s8 = sshll.u32 %s328_s0, 4  ;;  %s283_s9 = smov [#allocation5]   ;;  %s13_s8 = int_to_ptr.hbm [resolvable:$true] %s12_s8 }
   0x2   :  { %s14_s10 = sshll.u32 %s283_s9, 4  ;;  %s284_s11 = smov 16   ;;  %s15_s10 = int_to_ptr.vmem [resolvable:$true] %s14_s10 }
   0x3   :  { %s285_s12 = smov 1  }
   0x4   :  { %20 = dma.hbm_to_vmem [thread:$0]  %s13_s8, 128, %s15_s10, [#allocation6], %s284_s11, %s284_s11, %s285_s12  }
   0x5   :  { %279 = dma.done.wait [#allocation6], 128  }
   0x6   :  { %280 = vsyncadd [#allocation6], 4294967168  ;;  %v286_v0 = vmov 0.0   ;;  %v287_v1 = vmov 0   ;;  %v38_v2 = vld [vmem:[#allocation5] sm:$0x1] }
   0x7   :  { %31 = vst [vmem:[#allocation2] sm:$0xf] %v286_v0  ;;  %v59_v3 = vld [vmem:[#allocation5 + $0x1] sm:$0x1]  ;;  %v39_v5 = vunpack.c.0.s8 %v38_v2  ;;  %v80_v12 = vld [vmem:[#allocation5 + $0x2] sm:$0x1] }
   0x8   :  { %32 = vst [vmem:[#allocation3] sm:$0xf] %v286_v0  ;;  %v60_v6 = vunpack.c.0.s8 %v59_v3  ;;  %v81_v17 = vunpack.c.0.s8 %v80_v12  ;;  %v101_v21 = vld [vmem:[#allocation5 + $0x3] sm:$0x1]  ;;  %v122_v33 = vld [vmem:[#allocation5 + $0x4] sm:$0x1] }
   0x9   :  { %33 = vst [vmem:[#allocation4] sm:$0x1] %v287_v1  ;;  %v40_v9 = vcvt.s32.f32 %v39_v5  ;;  %v102_v28 = vunpack.c.0.s8 %v101_v21  ;;  %v123_v39 = vunpack.c.0.s8 %v122_v33  ;;  %v143_v46 = vld [vmem:[#allocation5 + $0x5] sm:$0x1]  ;;  %v164_v57 = vld [vmem:[#allocation5 + $0x6] sm:$0x1] }
   0xa   :  { %v61_v15 = vcvt.s32.f32 %v60_v6  ;;  %v82_v23 = vcvt.s32.f32 %v81_v17  ;;  %v144_v53 = vunpack.c.0.s8 %v143_v46  ;;  %v165_v2 = vunpack.c.0.s8 %v164_v57  ;;  %s288_s0 = smov [#allocation8]   ;;  %s212_s16 = sshll.u32 %s329_s1, 4  ;;  %s213_s16 = int_to_ptr.hbm [resolvable:$true] %s212_s16 }
   0xb   :  { %v41_v13 = vmul.f32 5632.0, %v40_v9  ;;  %v103_v37 = vcvt.s32.f32 %v102_v28  ;;  %v124_v49 = vcvt.s32.f32 %v123_v39  ;;  %s210_s13 = sshll.u32 %s288_s0, 4  ;;  %s211_s13 = int_to_ptr.vmem [resolvable:$true] %s210_s13 }
   0xc   :  { %v62_v20 = vmul.f32 5632.0, %v61_v15  ;;  %v83_v32 = vmul.f32 5632.0, %v82_v23  ;;  %v145_v61 = vcvt.s32.f32 %v144_v53  ;;  %v166_v9 = vcvt.s32.f32 %v165_v2 }
   0xd   :  { %v104_v44 = vmul.f32 5632.0, %v103_v37  ;;  %v125_v55 = vmul.f32 5632.0, %v124_v49 }
   0xe   :  { %v34_v4 = vld [vmem:[#allocation2] sm:$0xf]  ;;  %v146_v5 = vmul.f32 5632.0, %v145_v61 }
   0xf   :  { %v35_v7 = vld [vmem:[#allocation3] sm:$0xf]  ;;  %v42_v8 = vmul.f32 0.75, %v34_v4 }
  0x10   :  { %v45_v10 = vmul.f32 0.96875, %v35_v7  ;;  %v185_v7 = vld [vmem:[#allocation5 + $0x7] sm:$0x1]  ;;  %v36_v15 = vld [vmem:[#allocation4] sm:$0x1] }
  0x11   :  { %v43_v11 = vfloor.f32 %v42_v8  ;;  %37 = vst [vmem:[#allocation8] sm:$0x1] %v36_v15 }
  0x12   :  { %v46_v14 = vfloor.f32 %v45_v10 }
  0x13   :  { %v44_v16 = vadd.f32 %v43_v11, %v41_v13 }
  0x15   :  { %v47_v18 = vadd.f32 %v46_v14, %v44_v16  ;;  %v63_v19 = vmul.f32 0.75, %v44_v16  ;;  %v186_v14 = vunpack.c.0.s8 %v185_v7 }
  0x17   :  { %vm48_vm0 = vcmp.ge.f32.partialorder %v47_v18, 5120.0  ;;  %v64_v22 = vfloor.f32 %v63_v19  ;;  %v187_v23 = vcvt.s32.f32 %v186_v14 }
  0x18   :  { %v49_v24 = vsel %vm48_vm0, 0.0, %v47_v18  ;;  %vm50_vm1 = vmpackc.low %vm48_vm0, %vm48_vm0  ;;  %v167_v18 = vmul.f32 5632.0, %v166_v9 }
  0x19   :  { %v51_v25 = vsel %vm50_vm1, 16711935, %v287_v1  ;;  %v66_v26 = vmul.f32 0.96875, %v49_v24  ;;  %v65_v27 = vadd.f32 %v64_v22, %v62_v20  ;;  %v188_v28 = vmul.f32 5632.0, %v187_v23 }
  0x1a   :  { %v53_v29 = vpack.c.b8 %v51_v25, %v51_v25 }
  0x1b   :  { %v67_v30 = vfloor.f32 %v66_v26  ;;  %v84_v31 = vmul.f32 0.75, %v65_v27 }
  0x1c   :  { %vm54_vm2 = vnez %v53_v29 }
  0x1d   :  { %v55_v34 = vsel %vm54_vm2, 16843009, %v287_v1  ;;  %v68_v35 = vadd.f32 %v67_v30, %v65_v27  ;;  %v85_v36 = vfloor.f32 %v84_v31 }
  0x1e   :  { %57 = vst [vmem:[#allocation8 + $0x1] sm:$0x1] %v55_v34 }
  0x1f   :  { %vm69_vm3 = vcmp.ge.f32.partialorder %v68_v35, 5120.0  ;;  %v86_v38 = vadd.f32 %v85_v36, %v83_v32 }
  0x20   :  { %v70_v40 = vsel %vm69_vm3, 0.0, %v68_v35  ;;  %vm71_vm4 = vmpackc.low %vm69_vm3, %vm69_vm3 }
  0x21   :  { %v72_v41 = vsel %vm71_vm4, 16711935, %v287_v1  ;;  %v87_v42 = vmul.f32 0.96875, %v70_v40  ;;  %v105_v43 = vmul.f32 0.75, %v86_v38 }
  0x22   :  { %v74_v45 = vpack.c.b8 %v72_v41, %v72_v41 }
  0x23   :  { %v88_v47 = vfloor.f32 %v87_v42  ;;  %v106_v48 = vfloor.f32 %v105_v43 }
  0x24   :  { %vm75_vm5 = vnez %v74_v45 }
  0x25   :  { %v76_v50 = vsel %vm75_vm5, 16843009, %v287_v1  ;;  %v89_v51 = vadd.f32 %v88_v47, %v86_v38  ;;  %v107_v52 = vadd.f32 %v106_v48, %v104_v44 }
  0x26   :  { %78 = vst [vmem:[#allocation8 + $0x2] sm:$0x1] %v76_v50 }
  0x27   :  { %vm90_vm6 = vcmp.ge.f32.partialorder %v89_v51, 5120.0  ;;  %v126_v54 = vmul.f32 0.75, %v107_v52 }
  0x28   :  { %v91_v56 = vsel %vm90_vm6, 0.0, %v89_v51  ;;  %vm92_vm7 = vmpackc.low %vm90_vm6, %vm90_vm6 }
  0x29   :  { %v93_v58 = vsel %vm92_vm7, 16711935, %v287_v1  ;;  %v108_v59 = vmul.f32 0.96875, %v91_v56  ;;  %v127_v60 = vfloor.f32 %v126_v54 }
  0x2a   :  { %v95_v62 = vpack.c.b8 %v93_v58, %v93_v58 }
  0x2b   :  { %v109_v63 = vfloor.f32 %v108_v59  ;;  %v128_v0 = vadd.f32 %v127_v60, %v125_v55 }
  0x2c   :  { %vm96_vm8 = vnez %v95_v62 }
  0x2d   :  { %v97_v3 = vsel %vm96_vm8, 16843009, %v287_v1  ;;  %v110_v4 = vadd.f32 %v109_v63, %v107_v52  ;;  %v147_v6 = vmul.f32 0.75, %v128_v0 }
  0x2e   :  { %99 = vst [vmem:[#allocation8 + $0x3] sm:$0x1] %v97_v3 }
  0x2f   :  { %vm111_vm9 = vcmp.ge.f32.partialorder %v110_v4, 5120.0  ;;  %v148_v8 = vfloor.f32 %v147_v6 }
  0x30   :  { %v112_v10 = vsel %vm111_vm9, 0.0, %v110_v4  ;;  %vm113_vm10 = vmpackc.low %vm111_vm9, %vm111_vm9 }
  0x31   :  { %v114_v11 = vsel %vm113_vm10, 16711935, %v287_v1  ;;  %v129_v12 = vmul.f32 0.96875, %v112_v10  ;;  %v149_v13 = vadd.f32 %v148_v8, %v146_v5 }
  0x32   :  { %v116_v16 = vpack.c.b8 %v114_v11, %v114_v11 }
  0x33   :  { %v130_v17 = vfloor.f32 %v129_v12  ;;  %v168_v19 = vmul.f32 0.75, %v149_v13 }
  0x34   :  { %vm117_vm11 = vnez %v116_v16 }
  0x35   :  { %v118_v20 = vsel %vm117_vm11, 16843009, %v287_v1  ;;  %v131_v21 = vadd.f32 %v130_v17, %v128_v0  ;;  %v169_v22 = vfloor.f32 %v168_v19 }
  0x36   :  { %120 = vst [vmem:[#allocation8 + $0x4] sm:$0x1] %v118_v20 }
  0x37   :  { %vm132_vm12 = vcmp.ge.f32.partialorder %v131_v21, 5120.0  ;;  %v170_v24 = vadd.f32 %v169_v22, %v167_v18 }
  0x38   :  { %v133_v25 = vsel %vm132_vm12, 0.0, %v131_v21  ;;  %vm134_vm13 = vmpackc.low %vm132_vm12, %vm132_vm12 }
  0x39   :  { %v135_v26 = vsel %vm134_vm13, 16711935, %v287_v1  ;;  %v150_v27 = vmul.f32 0.96875, %v133_v25  ;;  %v189_v29 = vmul.f32 0.75, %v170_v24 }
  0x3a   :  { %v137_v30 = vpack.c.b8 %v135_v26, %v135_v26 }
  0x3b   :  { %v151_v31 = vfloor.f32 %v150_v27  ;;  %v190_v32 = vfloor.f32 %v189_v29 }
  0x3c   :  { %vm138_vm14 = vnez %v137_v30 }
  0x3d   :  { %v139_v33 = vsel %vm138_vm14, 16843009, %v287_v1  ;;  %v191_v34 = vadd.f32 %v190_v32, %v188_v28  ;;  %v152_v35 = vadd.f32 %v151_v31, %v149_v13 }
  0x3e   :  { %141 = vst [vmem:[#allocation8 + $0x5] sm:$0x1] %v139_v33 }
  0x3f   :  { %203 = vst [vmem:[#allocation2] sm:$0xf] %v191_v34  ;;  %vm153_vm15 = vcmp.ge.f32.partialorder %v152_v35, 5120.0 }
  0x40   :  { %v154_v36 = vsel %vm153_vm15, 0.0, %v152_v35  ;;  %vm155_vm0 = vmpackc.low %vm153_vm15, %vm153_vm15 }
  0x41   :  { %v156_v37 = vsel %vm155_vm0, 16711935, %v287_v1  ;;  %v171_v38 = vmul.f32 0.96875, %v154_v36 }
  0x42   :  { %v158_v39 = vpack.c.b8 %v156_v37, %v156_v37 }
  0x43   :  { %v172_v40 = vfloor.f32 %v171_v38 }
  0x44   :  { %vm159_vm1 = vnez %v158_v39 }
  0x45   :  { %v160_v41 = vsel %vm159_vm1, 16843009, %v287_v1  ;;  %v173_v42 = vadd.f32 %v172_v40, %v170_v24 }
  0x46   :  { %162 = vst [vmem:[#allocation8 + $0x6] sm:$0x1] %v160_v41 }
  0x47   :  { %vm174_vm2 = vcmp.ge.f32.partialorder %v173_v42, 5120.0 }
  0x48   :  { %v175_v43 = vsel %vm174_vm2, 0.0, %v173_v42  ;;  %vm176_vm3 = vmpackc.low %vm174_vm2, %vm174_vm2 }
  0x49   :  { %v177_v44 = vsel %vm176_vm3, 16711935, %v287_v1  ;;  %v192_v45 = vmul.f32 0.96875, %v175_v43 }
  0x4a   :  { %v179_v46 = vpack.c.b8 %v177_v44, %v177_v44 }
  0x4b   :  { %v193_v47 = vfloor.f32 %v192_v45 }
  0x4c   :  { %vm180_vm4 = vnez %v179_v46 }
  0x4d   :  { %v181_v48 = vsel %vm180_vm4, 16843009, %v287_v1  ;;  %v194_v49 = vadd.f32 %v193_v47, %v191_v34 }
  0x4e   :  { %183 = vst [vmem:[#allocation8 + $0x7] sm:$0x1] %v181_v48 }
  0x4f   :  { %vm195_vm5 = vcmp.ge.f32.partialorder %v194_v49, 5120.0  ;;  %218 = dma.vmem_to_hbm [thread:$0]  %s211_s13, 128, %s213_s16, [#allocation7], %s284_s11, %s284_s11, %s285_s12  }
  0x50   :  { %v196_v50 = vsel %vm195_vm5, 0.0, %v194_v49  ;;  %vm197_vm6 = vmpackc.low %vm195_vm5, %vm195_vm5 }
  0x51   :  { %204 = vst [vmem:[#allocation3] sm:$0xf] %v196_v50  ;;  %v198_v51 = vsel %vm197_vm6, 16711935, %v287_v1 }
  0x52   :  { %v200_v52 = vpack.c.b8 %v198_v51, %v198_v51 }
  0x54   :  { %vm201_vm7 = vnez %v200_v52 }
  0x55   :  { %v202_v53 = vsel %vm201_vm7, 16843009, %v287_v1 }
  0x56   :  { %205 = vst [vmem:[#allocation4] sm:$0x1] %v202_v53 }
  0x57   :  { %281 = dma.done.wait [#allocation7], 128  }
  0x58   :  { %282 = vsyncadd [#allocation7], 4294967168 }
  0x59   :  { %223 = vsyncpa [#allocation6], 1 }
  0x5a   :  { %224 = vsyncpa [#allocation7], 1 }

</bundles_post_ra>
